<compile_context>
chip_gen: v5e
topology: v5e:2x2
jax: 0.10.0
libtpu: 0.0.40
codegen_flags: <defaults>
</compile_context>

<pallas_src>
from typing import NamedTuple

import jax
import jax.numpy as jnp
from jax.experimental import pallas as pl
from jax.experimental.pallas import tpu as pltpu


def dualhead_kernel(x_ref, wb_ref, bb_ref, wh_ref, bh_ref, o_ref):
    # Shared trunk computed once per batch tile: h = relu(x @ Wb + bb), f32 accumulation.
    h = jnp.dot(x_ref[...], wb_ref[...], preferred_element_type=jnp.float32)
    h = jnp.maximum(h + bb_ref[...], 0.0)
    # Fused heads: one matmul producing [head0 | head1 (| zero-pad)].
    h = h.astype(wh_ref.dtype)  # keep MXU operands in the compute dtype (e.g. bf16)
    o = jnp.dot(h, wh_ref[...], preferred_element_type=jnp.float32) + bh_ref[...]
    o_ref[...] = o.astype(o_ref.dtype)


class DualheadParams(NamedTuple):
    wb: jax.Array   # (d_in, hid)  compute dtype
    bb: jax.Array   # (1, hid)     fp32
    wh: jax.Array   # (hid, n)     fused [W0 | W1 | pad], compute dtype
    bh: jax.Array   # (1, n)       fused biases (fp32)
    out0: int
    out1: int


def prepare_params(params, *, compute_dtype=None, pad_heads_to_lanes=True):
    """One-time head fusion + dtype cast (hoisted out of the per-forward path).

    params: (wb, bb, w0, b0, w1, b1) with Linear weights already laid out as (in, out).
    compute_dtype: MXU operand dtype.  bf16 recommended on v5e/v6e/v7x: the kernel is
      HBM-bound, so halving x/weight (and output) bytes is a direct win; accumulation
      stays fp32 on the MXU and bias-add/ReLU stay fp32 on the VPU.
    pad_heads_to_lanes: pad the fused head width to a multiple of 128 so the output
      store is an unmasked, lane-dense vst.  For tiny out0+out1 the extra zero-lane
      HBM writeback may cost more than the masked-store penalty — sweep per workload.
    """
    wb, bb, w0, b0, w1, b1 = params
    out0, out1 = int(w0.shape[1]), int(w1.shape[1])

    wh = jnp.concatenate([w0, w1], axis=1)
    bh = jnp.concatenate([b0, b1], axis=1)
    if pad_heads_to_lanes:
        n_fused = out0 + out1
        n_pad = pl.cdiv(n_fused, 128) * 128
        if n_pad != n_fused:
            wh = jnp.pad(wh, ((0, 0), (0, n_pad - n_fused)))
            bh = jnp.pad(bh, ((0, 0), (0, n_pad - n_fused)))

    cdt = jnp.dtype(compute_dtype) if compute_dtype is not None else jnp.dtype(wb.dtype)
    return DualheadParams(
        wb=jnp.asarray(wb, cdt),
        bb=jnp.asarray(bb, jnp.float32),
        wh=jnp.asarray(wh, cdt),
        bh=jnp.asarray(bh, jnp.float32),
        out0=out0,
        out1=out1,
    )


def _pick_tile_b(batch, tile_b_max):
    """Batch tile: multiple of 8, no larger than the (8-rounded) batch, and small enough
    that the grid has >= 2 steps when the batch allows it — so dimension_semantics=
    ("parallel",) actually feeds both v7x TensorCores."""
    b8 = max(8, pl.cdiv(batch, 8) * 8)
    tile = min(int(tile_b_max), b8)
    tile = pl.cdiv(tile, 8) * 8
    if b8 >= 16 and pl.cdiv(batch, tile) < 2:
        tile = pl.cdiv(pl.cdiv(b8, 2), 8) * 8
    return tile


def dualhead_forward(x, p: DualheadParams, *, tile_b=512, out_dtype=None,
                     split_heads=True):
    """x: (B, D_IN).  Returns (x0, x1) like Dualhead(names=None), or the fused
    (B, out0+out1) slab when split_heads=False (saves an extra HBM pass).

    Output dtype defaults to the prepared compute dtype (bf16 compute -> bf16 output:
    the fp32 store would otherwise dominate HBM traffic at these widths)."""
    B, d_in = x.shape
    hid = p.wb.shape[1]
    n = p.wh.shape[1]
    n_fused = p.out0 + p.out1
    cdt = jnp.dtype(p.wb.dtype)
    odt = jnp.dtype(out_dtype) if out_dtype is not None else cdt

    x_c = x.astype(cdt)
    tile = _pick_tile_b(B, tile_b)
    grid = (pl.cdiv(B, tile),)  # ragged last block: Pallas drops out-of-bounds writes

    # ---- VMEM budget: double-buffered x/out tiles + (worst-case double-buffered)
    #      resident weights, 2x slack; capped at ~75% of this chip's physical VMEM.
    est = (2 * tile * d_in * cdt.itemsize
           + 2 * tile * n * odt.itemsize
           + 2 * (d_in * hid + hid * n) * cdt.itemsize
           + 2 * (hid + n) * 4)
    try:
        vmem_cap = int(getattr(pltpu.get_tpu_info(), "vmem_capacity_bytes", 64 * 2**20))
    except Exception:
        vmem_cap = 64 * 2**20
    vmem_limit = int(min(int(0.75 * vmem_cap), max(16 * 2**20, 2 * est)))

    def _launch(single_buffer_weights):
        def resident(shape):
            # Constant index map => DMA'd once and held in VMEM across the whole grid.
            if single_buffer_weights:
                return pl.BlockSpec(shape, lambda i: (0, 0),
                                    pipeline_mode=pl.Buffered(1))
            return pl.BlockSpec(shape, lambda i: (0, 0))

        return pl.pallas_call(
            dualhead_kernel,
            out_shape=jax.ShapeDtypeStruct((B, n), odt),
            grid_spec=pl.GridSpec(
                grid=grid,
                in_specs=[
                    pl.BlockSpec((tile, d_in), lambda i: (i, 0)),  # x tile
                    resident((d_in, hid)),                         # Wb (resident)
                    resident((1, hid)),                            # bb
                    resident((hid, n)),                            # [W0|W1|pad] (resident)
                    resident((1, n)),                              # [b0|b1|pad]
                ],
                out_specs=pl.BlockSpec((tile, n), lambda i: (i, 0)),
            ),
            compiler_params=pltpu.CompilerParams(
                dimension_semantics=("parallel",),  # batch tiles shard across v7x TCs
                vmem_limit_bytes=vmem_limit,
            ),
        )(x_c, p.wb, p.bb, p.wh, p.bh)

    try:
        # Single-buffer the never-changing weights (halves their VMEM footprint —
        # matters for large hid/d_in on v7x's 64 MiB VMEM).
        out = jax.block_until_ready(_launch(True))
    except Exception:
        # pipeline_mode=pl.Buffered(1) not supported in this JAX build -> default buffering.
        out = _launch(False)

    if not split_heads:
        return out if n == n_fused else out[:, :n_fused]
    return out[:, :p.out0], out[:, p.out0:n_fused]


def init_params(key, d_in, hid, out0, out1):
    """Deterministic parameter init; nn.Linear stores W as (out, in) — transpose for kernel."""
    ks = jax.random.split(key, 6)
    wb_t = jax.random.normal(ks[0], (hid, d_in), jnp.float32) * (1.0 / jnp.sqrt(d_in))
    bb   = jax.random.normal(ks[1], (1, hid),    jnp.float32) * 0.01
    w0_t = jax.random.normal(ks[2], (out0, hid), jnp.float32) * (1.0 / jnp.sqrt(hid))
    b0   = jax.random.normal(ks[3], (1, out0),   jnp.float32) * 0.01
    w1_t = jax.random.normal(ks[4], (out1, hid), jnp.float32) * (1.0 / jnp.sqrt(hid))
    b1   = jax.random.normal(ks[5], (1, out1),   jnp.float32) * 0.01
    return (wb_t.T, bb, w0_t.T, b0, w1_t.T, b1)


def dualhead_ref(x, params):
    """Pure-JAX reference mirroring the PyTorch forward (base -> head0/head1)."""
    wb, bb, w0, b0, w1, b1 = params
    h = jnp.maximum(x @ wb + bb, 0.0)
    return (h @ w0 + b0, h @ w1 + b1)


if __name__ == "__main__":
    B, D_IN, HID, OUT0, OUT1 = 8, 32, 64, 16, 4

    key = jax.random.PRNGKey(0)
    kx, kp = jax.random.split(key)
    x = jax.random.normal(kx, (B, D_IN), jnp.float32)
    params = init_params(kp, D_IN, HID, OUT0, OUT1)

    r0, r1 = dualhead_ref(x, params)

    # fp32-operand path, lane-padded fused head (unmasked vst): close to the reference.
    p_f32 = prepare_params(params)  # fuse / pad / cast ONCE, outside the hot path
    x0, x1 = dualhead_forward(x, p_f32)
    jax.block_until_ready((x0, x1))
    assert x0.shape == (B, OUT0) and x1.shape == (B, OUT1)
    assert jnp.allclose(x0, r0, atol=1e-5, rtol=1e-5)
    assert jnp.allclose(x1, r1, atol=1e-5, rtol=1e-5)

    # Fused-slab return path (skips the two head slices / extra output pass).
    slab = dualhead_forward(x, p_f32, split_heads=False)
    jax.block_until_ready(slab)
    assert slab.shape == (B, OUT0 + OUT1)
    assert jnp.allclose(slab, jnp.concatenate([r0, r1], axis=1), atol=1e-5, rtol=1e-5)

    # bf16 path (recommended on v5e/v6e/v7x): bf16 operands AND bf16 output, unpadded
    # (narrow, masked-store) head width — the low-HBM-traffic variant.
    p_bf16 = prepare_params(params, compute_dtype=jnp.bfloat16, pad_heads_to_lanes=False)
    y0, y1 = dualhead_forward(x, p_bf16)
    jax.block_until_ready((y0, y1))
    assert y0.shape == (B, OUT0) and y1.shape == (B, OUT1)
    assert y0.dtype == jnp.bfloat16 and y1.dtype == jnp.bfloat16
    assert jnp.allclose(y0.astype(jnp.float32), r0, atol=5e-2, rtol=5e-2)
    assert jnp.allclose(y1.astype(jnp.float32), r1, atol=5e-2, rtol=5e-2)

    print("KERNEL_OK")
</pallas_src>

<mosaic_0001>
module attributes {stable_mosaic.version = 11 : i64} {
  func.func @dualhead_kernel(%arg0: i32, %arg1: memref<8x32xf32, #tpu.memory_space<vmem>>, %arg2: memref<32x64xf32, #tpu.memory_space<vmem>>, %arg3: memref<1x64xf32, #tpu.memory_space<vmem>>, %arg4: memref<64x128xf32, #tpu.memory_space<vmem>>, %arg5: memref<1x128xf32, #tpu.memory_space<vmem>>, %arg6: memref<8x128xf32, #tpu.memory_space<vmem>>) attributes {dimension_semantics = [#tpu.dimension_semantics<parallel>], iteration_bounds = array<i64: 1>, scalar_prefetch = 0 : i64, scratch_operands = 0 : i64, tpu.core_type = #tpu.core_type<tc>, window_params = [{transform_indices = @transform_0, window_bounds = array<i64: 8, 32>}, {pipeline_mode = #tpu.pipeline_mode<synchronous>, transform_indices = @transform_1, window_bounds = array<i64: 32, 64>}, {pipeline_mode = #tpu.pipeline_mode<synchronous>, transform_indices = @transform_2, window_bounds = array<i64: 1, 64>}, {pipeline_mode = #tpu.pipeline_mode<synchronous>, transform_indices = @transform_3, window_bounds = array<i64: 64, 128>}, {pipeline_mode = #tpu.pipeline_mode<synchronous>, transform_indices = @transform_4, window_bounds = array<i64: 1, 128>}, {transform_indices = @transform_5, window_bounds = array<i64: 8, 128>}]} {
    %c0 = arith.constant 0 : index
    %c0_0 = arith.constant 0 : index
    %0 = vector.load %arg1[%c0, %c0_0] : memref<8x32xf32, #tpu.memory_space<vmem>>, vector<8x32xf32>
    %c0_1 = arith.constant 0 : index
    %c0_2 = arith.constant 0 : index
    %1 = vector.load %arg2[%c0_1, %c0_2] : memref<32x64xf32, #tpu.memory_space<vmem>>, vector<32x64xf32>
    %cst = arith.constant dense<0.000000e+00> : vector<8x64xf32>
    %2 = tpu.matmul %0, %1, %cst {dimension_numbers = #tpu.dot_dimension_numbers<[1], [0], [0], [1], [0, 0, 1, 1], [], []>} : vector<8x32xf32>, vector<32x64xf32>, vector<8x64xf32> -> vector<8x64xf32>
    %c0_3 = arith.constant 0 : index
    %c0_4 = arith.constant 0 : index
    %3 = vector.load %arg3[%c0_3, %c0_4] : memref<1x64xf32, #tpu.memory_space<vmem>>, vector<1x64xf32>
    %4 = vector.broadcast %3 : vector<1x64xf32> to vector<8x64xf32>
    %5 = arith.addf %2, %4 : vector<8x64xf32>
    %cst_5 = arith.constant 0.000000e+00 : f32
    %6 = vector.broadcast %cst_5 : f32 to vector<8x64xf32>
    %7 = arith.maximumf %5, %6 : vector<8x64xf32>
    %c0_6 = arith.constant 0 : index
    %c0_7 = arith.constant 0 : index
    %8 = vector.load %arg4[%c0_6, %c0_7] : memref<64x128xf32, #tpu.memory_space<vmem>>, vector<64x128xf32>
    %cst_8 = arith.constant dense<0.000000e+00> : vector<8x128xf32>
    %9 = tpu.matmul %7, %8, %cst_8 {dimension_numbers = #tpu.dot_dimension_numbers<[1], [0], [0], [1], [0, 0, 1, 1], [], []>} : vector<8x64xf32>, vector<64x128xf32>, vector<8x128xf32> -> vector<8x128xf32>
    %c0_9 = arith.constant 0 : index
    %c0_10 = arith.constant 0 : index
    %10 = vector.load %arg5[%c0_9, %c0_10] : memref<1x128xf32, #tpu.memory_space<vmem>>, vector<1x128xf32>
    %11 = vector.broadcast %10 : vector<1x128xf32> to vector<8x128xf32>
    %12 = arith.addf %9, %11 : vector<8x128xf32>
    %c0_11 = arith.constant 0 : index
    %c0_12 = arith.constant 0 : index
    %13 = vector.load %arg6[%c0_11, %c0_12] : memref<8x128xf32, #tpu.memory_space<vmem>>, vector<8x128xf32>
    tpu.vector_store %arg6[%c0_11, %c0_12], %12 {strides = array<i32>} : memref<8x128xf32, #tpu.memory_space<vmem>>, vector<8x128xf32>,
    return
  }
  func.func @transform_0(%arg0: i32) -> (i32, i32) {
    %c0_i32 = arith.constant 0 : i32
    %c0_i32_0 = arith.constant 0 : i32
    return %arg0, %c0_i32 : i32, i32
  }
  func.func @transform_1(%arg0: i32) -> (i32, i32) {
    %c0_i32 = arith.constant 0 : i32
    %c0_i32_0 = arith.constant 0 : i32
    %c0_i32_1 = arith.constant 0 : i32
    return %c0_i32, %c0_i32_0 : i32, i32
  }
  func.func @transform_2(%arg0: i32) -> (i32, i32) {
    %c0_i32 = arith.constant 0 : i32
    %c0_i32_0 = arith.constant 0 : i32
    %c0_i32_1 = arith.constant 0 : i32
    return %c0_i32, %c0_i32_0 : i32, i32
  }
  func.func @transform_3(%arg0: i32) -> (i32, i32) {
    %c0_i32 = arith.constant 0 : i32
    %c0_i32_0 = arith.constant 0 : i32
    %c0_i32_1 = arith.constant 0 : i32
    return %c0_i32, %c0_i32_0 : i32, i32
  }
  func.func @transform_4(%arg0: i32) -> (i32, i32) {
    %c0_i32 = arith.constant 0 : i32
    %c0_i32_0 = arith.constant 0 : i32
    %c0_i32_1 = arith.constant 0 : i32
    return %c0_i32, %c0_i32_0 : i32, i32
  }
  func.func @transform_5(%arg0: i32) -> (i32, i32) {
    %c0_i32 = arith.constant 0 : i32
    %c0_i32_0 = arith.constant 0 : i32
    return %arg0, %c0_i32 : i32, i32
  }
}

module attributes {stable_mosaic.version = 11 : i64} {
  func.func @dualhead_kernel(%arg0: i32, %arg1: memref<8x32xf32, #tpu.memory_space<vmem>>, %arg2: memref<32x64xf32, #tpu.memory_space<vmem>>, %arg3: memref<1x64xf32, #tpu.memory_space<vmem>>, %arg4: memref<64x128xf32, #tpu.memory_space<vmem>>, %arg5: memref<1x128xf32, #tpu.memory_space<vmem>>, %arg6: memref<8x128xf32, #tpu.memory_space<vmem>>) attributes {dimension_semantics = [#tpu.dimension_semantics<parallel>], iteration_bounds = array<i64: 1>, scalar_prefetch = 0 : i64, scratch_operands = 0 : i64, tpu.core_type = #tpu.core_type<tc>, window_params = [{transform_indices = @transform_0, window_bounds = array<i64: 8, 32>}, {pipeline_mode = #tpu.pipeline_mode<synchronous>, transform_indices = @transform_1, window_bounds = array<i64: 32, 64>}, {pipeline_mode = #tpu.pipeline_mode<synchronous>, transform_indices = @transform_2, window_bounds = array<i64: 1, 64>}, {pipeline_mode = #tpu.pipeline_mode<synchronous>, transform_indices = @transform_3, window_bounds = array<i64: 64, 128>}, {pipeline_mode = #tpu.pipeline_mode<synchronous>, transform_indices = @transform_4, window_bounds = array<i64: 1, 128>}, {transform_indices = @transform_5, window_bounds = array<i64: 8, 128>}]} {
    %c0 = arith.constant 0 : index
    %c0_0 = arith.constant 0 : index
    %0 = vector.load %arg1[%c0, %c0_0] : memref<8x32xf32, #tpu.memory_space<vmem>>, vector<8x32xf32>
    %c0_1 = arith.constant 0 : index
    %c0_2 = arith.constant 0 : index
    %1 = vector.load %arg2[%c0_1, %c0_2] : memref<32x64xf32, #tpu.memory_space<vmem>>, vector<32x64xf32>
    %cst = arith.constant dense<0.000000e+00> : vector<8x64xf32>
    %2 = tpu.matmul %0, %1, %cst {dimension_numbers = #tpu.dot_dimension_numbers<[1], [0], [0], [1], [0, 0, 1, 1], [], []>} : vector<8x32xf32>, vector<32x64xf32>, vector<8x64xf32> -> vector<8x64xf32>
    %c0_3 = arith.constant 0 : index
    %c0_4 = arith.constant 0 : index
    %3 = vector.load %arg3[%c0_3, %c0_4] : memref<1x64xf32, #tpu.memory_space<vmem>>, vector<1x64xf32>
    %4 = vector.broadcast %3 : vector<1x64xf32> to vector<8x64xf32>
    %5 = arith.addf %2, %4 : vector<8x64xf32>
    %cst_5 = arith.constant 0.000000e+00 : f32
    %6 = vector.broadcast %cst_5 : f32 to vector<8x64xf32>
    %7 = arith.maximumf %5, %6 : vector<8x64xf32>
    %c0_6 = arith.constant 0 : index
    %c0_7 = arith.constant 0 : index
    %8 = vector.load %arg4[%c0_6, %c0_7] : memref<64x128xf32, #tpu.memory_space<vmem>>, vector<64x128xf32>
    %cst_8 = arith.constant dense<0.000000e+00> : vector<8x128xf32>
    %9 = tpu.matmul %7, %8, %cst_8 {dimension_numbers = #tpu.dot_dimension_numbers<[1], [0], [0], [1], [0, 0, 1, 1], [], []>} : vector<8x64xf32>, vector<64x128xf32>, vector<8x128xf32> -> vector<8x128xf32>
    %c0_9 = arith.constant 0 : index
    %c0_10 = arith.constant 0 : index
    %10 = vector.load %arg5[%c0_9, %c0_10] : memref<1x128xf32, #tpu.memory_space<vmem>>, vector<1x128xf32>
    %11 = vector.broadcast %10 : vector<1x128xf32> to vector<8x128xf32>
    %12 = arith.addf %9, %11 : vector<8x128xf32>
    %c0_11 = arith.constant 0 : index
    %c0_12 = arith.constant 0 : index
    %13 = vector.load %arg6[%c0_11, %c0_12] : memref<8x128xf32, #tpu.memory_space<vmem>>, vector<8x128xf32>
    tpu.vector_store %arg6[%c0_11, %c0_12], %12 {strides = array<i32>} : memref<8x128xf32, #tpu.memory_space<vmem>>, vector<8x128xf32>,
    return
  }
  func.func @transform_0(%arg0: i32) -> (i32, i32) {
    %c0_i32 = arith.constant 0 : i32
    %c0_i32_0 = arith.constant 0 : i32
    return %arg0, %c0_i32 : i32, i32
  }
  func.func @transform_1(%arg0: i32) -> (i32, i32) {
    %c0_i32 = arith.constant 0 : i32
    %c0_i32_0 = arith.constant 0 : i32
    %c0_i32_1 = arith.constant 0 : i32
    return %c0_i32, %c0_i32_0 : i32, i32
  }
  func.func @transform_2(%arg0: i32) -> (i32, i32) {
    %c0_i32 = arith.constant 0 : i32
    %c0_i32_0 = arith.constant 0 : i32
    %c0_i32_1 = arith.constant 0 : i32
    return %c0_i32, %c0_i32_0 : i32, i32
  }
  func.func @transform_3(%arg0: i32) -> (i32, i32) {
    %c0_i32 = arith.constant 0 : i32
    %c0_i32_0 = arith.constant 0 : i32
    %c0_i32_1 = arith.constant 0 : i32
    return %c0_i32, %c0_i32_0 : i32, i32
  }
  func.func @transform_4(%arg0: i32) -> (i32, i32) {
    %c0_i32 = arith.constant 0 : i32
    %c0_i32_0 = arith.constant 0 : i32
    %c0_i32_1 = arith.constant 0 : i32
    return %c0_i32, %c0_i32_0 : i32, i32
  }
  func.func @transform_5(%arg0: i32) -> (i32, i32) {
    %c0_i32 = arith.constant 0 : i32
    %c0_i32_0 = arith.constant 0 : i32
    return %arg0, %c0_i32 : i32, i32
  }
}

</mosaic_0001>

<bundles_post_ra>
// kernel: tpu_custom_call.1
= control target key start
LH: loop header
LB: loop body
LE: loop exit
PB: predicated region body
PF: predicated region fallthrough
CT: control target
= control target key end

     0   :  { %10 = vsyncpa [#allocation3], 0  ;;  %s321_s0 = inlined_call_operand.hbm [shape: f32[8,32], index: 0, kind: input, shape index: {}]   ;;  %s322_s1 = inlined_call_operand.hbm [shape: f32[32,64], index: 1, kind: input, shape index: {}]   ;;  %s323_s2 = inlined_call_operand.vmem [shape: f32[1,64], index: 2, kind: input, shape index: {}]   ;;  %s324_s3 = inlined_call_operand.hbm [shape: f32[64,128], index: 3, kind: input, shape index: {}]   ;;  %s325_s4 = inlined_call_operand.vmem [shape: f32[1,128], index: 4, kind: input, shape index: {}]   ;;  %s326_s5 = inlined_call_operand.hbm [shape: f32[8,128], index: 5, kind: output, shape index: {}]  }
   0x1   :  { %11 = vsyncpa [#allocation6], 0  ;;  %s28_s20 = sshll.u32 %s322_s1, 4  ;;  %s29_s20 = int_to_ptr.hbm [resolvable:$true] %s28_s20 }
   0x2   :  { %12 = vsyncpa [#allocation4], 0  ;;  %s267_s21 = smov [#allocation5]   ;;  %s18_s25 = sshll.u32 %s321_s0, 4  ;;  %s19_s25 = int_to_ptr.hbm [resolvable:$true] %s18_s25 }
   0x3   :  { %s30_s22 = sshll.u32 %s267_s21, 4  ;;  %s268_s26 = smov 128   ;;  %s31_s22 = int_to_ptr.vmem [resolvable:$true] %s30_s22 }
   0x4   :  { %s269_s27 = smov 8   ;;  %s270_s28 = smov [#allocation2]  }
   0x5   :  { %36 = dma.hbm_to_vmem [thread:$0]  %s29_s20, 512, %s31_s22, [#allocation6], %s268_s26, %s268_s26, %s269_s27  }
   0x6   :  { %s20_s29 = sshll.u32 %s270_s28, 4  ;;  %s43_s7 = sshll.u32 %s324_s3, 4  ;;  %s21_s29 = int_to_ptr.vmem [resolvable:$true] %s20_s29  ;;  %s44_s7 = int_to_ptr.hbm [resolvable:$true] %s43_s7 }
   0x7   :  { %23 = dma.hbm_to_vmem [thread:$0]  %s19_s25, 128, %s21_s29, [#allocation3]  }
   0x8   :  { %s271_s1 = smov [#allocation7]  }
   0x9   :  { %s45_s8 = sshll.u32 %s271_s1, 4  ;;  %s46_s8 = int_to_ptr.vmem [resolvable:$true] %s45_s8 }
   0xa   :  { %51 = dma.hbm_to_vmem [thread:$0]  %s44_s7, 1024, %s46_s8, [#allocation6], %s268_s26, %s268_s26, %s269_s27  }
   0xb   :  { %261 = dma.done.wait [#allocation3], 128  }
   0xc   :  { %262 = vsyncadd [#allocation3], 4294967168 }
   0xd   :  { %263 = dma.done.wait [#allocation6], 1536  }
   0xe   :  { %264 = vsyncadd [#allocation6], 4294965760  ;;  %v70_v0 = vld [vmem:[#allocation5 + $0x18] sm:$0xff]  ;;  %v69_v1 = vld [vmem:[#allocation5 + $0x10] sm:$0xff]  ;;  %vm75_vm0 = vcmask 261120   ;;  %vm112_vm1 = vcmask 523264  }
   0xf   :  { %91 = vmatpush.msra.mxu0 %v70_v0  ;;  %v107_v2 = vld [vmem:[#allocation7 + $0x38] sm:$0xff]  ;;  %v68_v3 = vld [vmem:[#allocation5 + $0x8] sm:$0xff]  ;;  %v106_v4 = vld [vmem:[#allocation7 + $0x30] sm:$0xff]  ;;  %s272_s11 = smov [#allocation8]   ;;  %s144_s15 = sshll.u32 %s326_s5, 4  ;;  %s145_s15 = int_to_ptr.hbm [resolvable:$true] %s144_s15 }
  0x10   :  { %124 = vmatpush.msra.mxu1 %v107_v2  ;;  %v105_v5 = vld [vmem:[#allocation7 + $0x28] sm:$0xff]  ;;  %v67_v6 = vld [vmem:[#allocation5] sm:$0xff]  ;;  %v66_v7 = vld [vmem:[#allocation2] sm:$0xff]  ;;  %s142_s12 = sshll.u32 %s272_s11, 4  ;;  %s143_s12 = int_to_ptr.vmem [resolvable:$true] %s142_s12 }
  0x11   :  { %92 = vmatpush.msra.mxu0 %v69_v1  ;;  %v104_v8 = vld [vmem:[#allocation7 + $0x20] sm:$0xff]  ;;  %v103_v9 = vld [vmem:[#allocation7 + $0x18] sm:$0xff]  ;;  %v102_v10 = vld [vmem:[#allocation7 + $0x10] sm:$0xff] }
  0x12   :  { %125 = vmatpush.msra.mxu1 %v106_v4  ;;  %v101_v11 = vld [vmem:[#allocation7 + $0x8] sm:$0xff]  ;;  %v100_v12 = vld [vmem:[#allocation7] sm:$0xff]  ;;  %v163_v13 = vld [vmem:[%s323_s2] ss:$0 sm:$0xff] }
  0x13   :  { %93 = vmatpush.msra.mxu0 %v68_v3  ;;  %v164_v17 = vld [vmem:[%s325_s4] ss:$0 sm:$0xff] }
  0x14   :  { %126 = vmatpush.msra.mxu1 %v105_v5 }
  0x15   :  { %94 = vmatpush.msra.mxu0 %v67_v6 }
  0x16   :  { %155 = vmatmul.msk.f32.vlgmr.msra.gmra.mxu0 %vm75_vm0, %v66_v7  ;;  %127 = vmatpush.msra.mxu1 %v104_v8 }
  0x18   :  { %128 = vmatpush.msra.mxu1 %v103_v9 }
  0x1a   :  { %129 = vmatpush.msra.mxu1 %v102_v10 }
  0x1c   :  { %130 = vmatpush.msra.mxu1 %v101_v11 }
  0x1e   :  { %131 = vmatpush.msra.mxu1 %v100_v12 }
  0x93   :  { %v96_v14 = vpop.f32.mrf.mxu0 }
  0x94   :  { %v97_v15 = vadd.f32 %v163_v13, %v96_v14 }
  0x96   :  { %v99_v16 = vmax.f32 %v97_v15, 0.0 }
  0x98   :  { %156 = vmatmul.msk.f32.vlgmr.msra.gmra.mxu1 %vm112_vm1, %v99_v16 }
 0x115   :  { %v133_v18 = vpop.f32.mrf.mxu1 }
 0x116   :  { %v134_v19 = vadd.f32 %v164_v17, %v133_v18 }
 0x118   :  { %136 = vst [vmem:[#allocation8] sm:$0xff] %v134_v19 }
 0x119   :  { %147 = dma.vmem_to_hbm [thread:$0]  %s143_s12, 128, %s145_s15, [#allocation4]  }
 0x11a   :  { %265 = dma.done.wait [#allocation4], 128  }
 0x11b   :  { %266 = vsyncadd [#allocation4], 4294967168 }
 0x11c   :  { %152 = vsyncpa [#allocation3], 1 }
 0x11d   :  { %153 = vsyncpa [#allocation6], 1 }
 0x11e   :  { %154 = vsyncpa [#allocation4], 1 }

// kernel: tpu_custom_call.1
= control target key start
LH: loop header
LB: loop body
LE: loop exit
PB: predicated region body
PF: predicated region fallthrough
CT: control target
= control target key end

     0   :  { %10 = vsyncpa [#allocation3], 0  ;;  %s321_s0 = inlined_call_operand.hbm [shape: f32[8,32], index: 0, kind: input, shape index: {}]   ;;  %s322_s1 = inlined_call_operand.hbm [shape: f32[32,64], index: 1, kind: input, shape index: {}]   ;;  %s323_s2 = inlined_call_operand.vmem [shape: f32[1,64], index: 2, kind: input, shape index: {}]   ;;  %s324_s3 = inlined_call_operand.hbm [shape: f32[64,128], index: 3, kind: input, shape index: {}]   ;;  %s325_s4 = inlined_call_operand.vmem [shape: f32[1,128], index: 4, kind: input, shape index: {}]   ;;  %s326_s5 = inlined_call_operand.hbm [shape: f32[8,128], index: 5, kind: output, shape index: {}]  }
   0x1   :  { %11 = vsyncpa [#allocation6], 0  ;;  %s28_s20 = sshll.u32 %s322_s1, 4  ;;  %s29_s20 = int_to_ptr.hbm [resolvable:$true] %s28_s20 }
   0x2   :  { %12 = vsyncpa [#allocation4], 0  ;;  %s267_s21 = smov [#allocation5]   ;;  %s18_s25 = sshll.u32 %s321_s0, 4  ;;  %s19_s25 = int_to_ptr.hbm [resolvable:$true] %s18_s25 }
   0x3   :  { %s30_s22 = sshll.u32 %s267_s21, 4  ;;  %s268_s26 = smov 128   ;;  %s31_s22 = int_to_ptr.vmem [resolvable:$true] %s30_s22 }
   0x4   :  { %s269_s27 = smov 8   ;;  %s270_s28 = smov [#allocation2]  }
   0x5   :  { %36 = dma.hbm_to_vmem [thread:$0]  %s29_s20, 512, %s31_s22, [#allocation6], %s268_s26, %s268_s26, %s269_s27  }
   0x6   :  { %s20_s29 = sshll.u32 %s270_s28, 4  ;;  %s43_s7 = sshll.u32 %s324_s3, 4  ;;  %s21_s29 = int_to_ptr.vmem [resolvable:$true] %s20_s29  ;;  %s44_s7 = int_to_ptr.hbm [resolvable:$true] %s43_s7 }
   0x7   :  { %23 = dma.hbm_to_vmem [thread:$0]  %s19_s25, 128, %s21_s29, [#allocation3]  }
   0x8   :  { %s271_s1 = smov [#allocation7]  }
   0x9   :  { %s45_s8 = sshll.u32 %s271_s1, 4  ;;  %s46_s8 = int_to_ptr.vmem [resolvable:$true] %s45_s8 }
   0xa   :  { %51 = dma.hbm_to_vmem [thread:$0]  %s44_s7, 1024, %s46_s8, [#allocation6], %s268_s26, %s268_s26, %s269_s27  }
   0xb   :  { %261 = dma.done.wait [#allocation3], 128  }
   0xc   :  { %262 = vsyncadd [#allocation3], 4294967168 }
   0xd   :  { %263 = dma.done.wait [#allocation6], 1536  }
   0xe   :  { %264 = vsyncadd [#allocation6], 4294965760  ;;  %v70_v0 = vld [vmem:[#allocation5 + $0x18] sm:$0xff]  ;;  %v69_v1 = vld [vmem:[#allocation5 + $0x10] sm:$0xff]  ;;  %vm75_vm0 = vcmask 261120   ;;  %vm112_vm1 = vcmask 523264  }
   0xf   :  { %91 = vmatpush.msra.mxu0 %v70_v0  ;;  %v107_v2 = vld [vmem:[#allocation7 + $0x38] sm:$0xff]  ;;  %v68_v3 = vld [vmem:[#allocation5 + $0x8] sm:$0xff]  ;;  %v106_v4 = vld [vmem:[#allocation7 + $0x30] sm:$0xff]  ;;  %s272_s11 = smov [#allocation8]   ;;  %s144_s15 = sshll.u32 %s326_s5, 4  ;;  %s145_s15 = int_to_ptr.hbm [resolvable:$true] %s144_s15 }
  0x10   :  { %124 = vmatpush.msra.mxu1 %v107_v2  ;;  %v105_v5 = vld [vmem:[#allocation7 + $0x28] sm:$0xff]  ;;  %v67_v6 = vld [vmem:[#allocation5] sm:$0xff]  ;;  %v66_v7 = vld [vmem:[#allocation2] sm:$0xff]  ;;  %s142_s12 = sshll.u32 %s272_s11, 4  ;;  %s143_s12 = int_to_ptr.vmem [resolvable:$true] %s142_s12 }
  0x11   :  { %92 = vmatpush.msra.mxu0 %v69_v1  ;;  %v104_v8 = vld [vmem:[#allocation7 + $0x20] sm:$0xff]  ;;  %v103_v9 = vld [vmem:[#allocation7 + $0x18] sm:$0xff]  ;;  %v102_v10 = vld [vmem:[#allocation7 + $0x10] sm:$0xff] }
  0x12   :  { %125 = vmatpush.msra.mxu1 %v106_v4  ;;  %v101_v11 = vld [vmem:[#allocation7 + $0x8] sm:$0xff]  ;;  %v100_v12 = vld [vmem:[#allocation7] sm:$0xff]  ;;  %v163_v13 = vld [vmem:[%s323_s2] ss:$0 sm:$0xff] }
  0x13   :  { %93 = vmatpush.msra.mxu0 %v68_v3  ;;  %v164_v17 = vld [vmem:[%s325_s4] ss:$0 sm:$0xff] }
  0x14   :  { %126 = vmatpush.msra.mxu1 %v105_v5 }
  0x15   :  { %94 = vmatpush.msra.mxu0 %v67_v6 }
  0x16   :  { %155 = vmatmul.msk.f32.vlgmr.msra.gmra.mxu0 %vm75_vm0, %v66_v7  ;;  %127 = vmatpush.msra.mxu1 %v104_v8 }
  0x18   :  { %128 = vmatpush.msra.mxu1 %v103_v9 }
  0x1a   :  { %129 = vmatpush.msra.mxu1 %v102_v10 }
  0x1c   :  { %130 = vmatpush.msra.mxu1 %v101_v11 }
  0x1e   :  { %131 = vmatpush.msra.mxu1 %v100_v12 }
  0x93   :  { %v96_v14 = vpop.f32.mrf.mxu0 }
  0x94   :  { %v97_v15 = vadd.f32 %v163_v13, %v96_v14 }
  0x96   :  { %v99_v16 = vmax.f32 %v97_v15, 0.0 }
  0x98   :  { %156 = vmatmul.msk.f32.vlgmr.msra.gmra.mxu1 %vm112_vm1, %v99_v16 }
 0x115   :  { %v133_v18 = vpop.f32.mrf.mxu1 }
 0x116   :  { %v134_v19 = vadd.f32 %v164_v17, %v133_v18 }
 0x118   :  { %136 = vst [vmem:[#allocation8] sm:$0xff] %v134_v19 }
 0x119   :  { %147 = dma.vmem_to_hbm [thread:$0]  %s143_s12, 128, %s145_s15, [#allocation4]  }
 0x11a   :  { %265 = dma.done.wait [#allocation4], 128  }
 0x11b   :  { %266 = vsyncadd [#allocation4], 4294967168 }
 0x11c   :  { %152 = vsyncpa [#allocation3], 1 }
 0x11d   :  { %153 = vsyncpa [#allocation6], 1 }
 0x11e   :  { %154 = vsyncpa [#allocation4], 1 }

</bundles_post_ra>
